<compile_context>
chip_gen: v7x
topology: tpu7x:2x2x1
jax: 0.10.0
libtpu: 0.0.40
codegen_flags: <defaults>
</compile_context>

<pallas_src>
import jax
import jax.numpy as jnp
from jax import lax
from jax.experimental import pallas as pl
from jax.experimental.pallas import tpu as pltpu


_ROWS = 8       # xyz (3) padded to one full sublane group; rows 3..7 are zero.
_N_TILE = 512   # node tile (lane axis of force^T / sel)
_E_TILE = 4096  # edge tile (reduction axis): each per-sign f32 sel temp is
                # 512*4096*4 B = 8 MiB -> fits comfortably in 32 MiB scoped
                # VMEM on v5e/v6e and inside v7x's 64 MiB physical VMEM.


def _round_up(x, m):
    return ((x + m - 1) // m) * m


def _scatter_force_kernel(occ_ref, idx_ref, dEdr_ref, force_ref):
    """One (node-tile, edge-tile) grid step of the transposed scatter matmul.

    occ_ref  : (n_blocks, e_blocks) int32 SMEM (scalar prefetch)
               occ[ni, ei] != 0 iff some edge in edge tile ei touches node tile ni
    idx_ref  : (2, E_tile)    int32  row0 = src node id, row1 = dst node id
                                     (-1 padding never matches a node id >= 0)
    dEdr_ref : (ROWS, E_tile) f32    rows 0..2 = dE/dr^T (x,y,z), rows 3..7 = 0
    force_ref: (ROWS, N_tile) f32    force^T accumulator, resident across the
                                     edge (reduction) grid axis
    """
    # program_id must be read at kernel top level (NOT inside pl.when bodies):
    # nested uses fail interpret-mode lowering and add nothing on Mosaic.
    ni = pl.program_id(0)
    ei = pl.program_id(1)
    n_tile = force_ref.shape[1]

    @pl.when(ei == 0)
    def _init():
        force_ref[...] = jnp.zeros_like(force_ref)

    # Tile skipping: only pay the O(n_tile*e_tile) sel build + matmul when this
    # edge tile actually touches this node tile.
    @pl.when(occ_ref[ni, ei] > 0)
    def _compute():
        nid = lax.broadcasted_iota(jnp.int32, (n_tile, 1), 0) + ni * n_tile
        src = idx_ref[0:1, :]                 # (1, E_tile): bcast over sublanes
        dst = idx_ref[1:2, :]
        dEdr = dEdr_ref[...]                  # (ROWS, E_tile) f32

        # + scatter over src:  force^T += dE/dr^T @ sel_src^T
        # (contract the edge axis of both operands; same Q@K^T-style contraction
        #  used by the reference flash-attention kernel -> no big-tile transpose)
        sel_src = (nid == src).astype(jnp.float32)      # (N_tile, E_tile) in {0,1}
        force_ref[...] += lax.dot_general(
            dEdr, sel_src, (((1,), (1,)), ((), ())),
            precision=lax.Precision.HIGHEST,
            preferred_element_type=jnp.float32)

        # - scatter over dst:  force^T -= dE/dr^T @ sel_dst^T
        sel_dst = (nid == dst).astype(jnp.float32)
        force_ref[...] -= lax.dot_general(
            dEdr, sel_dst, (((1,), (1,)), ((), ())),
            precision=lax.Precision.HIGHEST,
            preferred_element_type=jnp.float32)


def force_from_edges(dE_dr, edge_idx, tot_num, *, n_tile=_N_TILE, e_tile=_E_TILE):
    """force[tot_num,3] = scatter(dE_dr, edge_idx[0]) - scatter(dE_dr, edge_idx[1])."""
    num_edges = dE_dr.shape[0]

    e_pad = _round_up(max(num_edges, 1), 128)
    e_tile = min(e_tile, e_pad)
    e_pad = _round_up(e_pad, e_tile)

    n_pad0 = _round_up(max(tot_num, 1), 128)
    # v7x megacore: keep >= 2 node tiles on the "parallel" axis whenever
    # tot_num > 128, so both TensorCores get work.
    n_tile = min(n_tile, max(128, _round_up(n_pad0 // 2, 128)))
    n_pad = _round_up(n_pad0, n_tile)

    n_blocks = n_pad // n_tile
    e_blocks = e_pad // e_tile

    # Packed (2, E_pad) edge indices: one lane-dense block; -1 padding never
    # matches a real node id.
    idx = jnp.full((2, e_pad), -1, jnp.int32)
    idx = idx.at[:, :num_edges].set(edge_idx.astype(jnp.int32))

    # Transposed dE/dr in (ROWS, E_pad): ~32 B/edge of VMEM/DMA instead of the
    # ~512 B/edge a lane-padded (E, 3) layout would cost.
    dEdr_t = jnp.zeros((_ROWS, e_pad), jnp.float32)
    dEdr_t = dEdr_t.at[:3, :num_edges].set(dE_dr.T.astype(jnp.float32))

    # Scalar-prefetched occupancy map: occ[ni, ei] = 1 iff some edge in edge
    # tile ei has src or dst inside node tile ni. Lets the kernel skip empty
    # (node-tile, edge-tile) pairs -> ~O(E) work for bucketed/sorted edges.
    # TODO(synk): for very large systems replace this dense (n_blocks, e_blocks)
    # SMEM map with per-node-tile contiguous edge-tile ranges over host-sorted
    # edges (two passes: +src-sorted / -dst-sorted) so SMEM stays O(n_blocks).
    epos = jnp.arange(e_pad, dtype=jnp.int32)
    e_blk = epos // e_tile
    valid = (epos < num_edges).astype(jnp.int32)
    src_blk = jnp.clip(idx[0], 0, n_pad - 1) // n_tile
    dst_blk = jnp.clip(idx[1], 0, n_pad - 1) // n_tile
    occ = jnp.zeros((n_blocks, e_blocks), jnp.int32)
    occ = occ.at[src_blk, e_blk].max(valid)
    occ = occ.at[dst_blk, e_blk].max(valid)

    # HBM traffic: idx + dEdr_t are re-streamed once per node tile.
    bytes_accessed = (n_blocks * (idx.size + dEdr_t.size) * 4
                      + _ROWS * n_pad * 4 + occ.size * 4)

    force_t = pl.pallas_call(
        _scatter_force_kernel,
        out_shape=jax.ShapeDtypeStruct((_ROWS, n_pad), jnp.float32),
        grid_spec=pltpu.PrefetchScalarGridSpec(
            num_scalar_prefetch=1,
            grid=(n_blocks, e_blocks),
            in_specs=[
                pl.BlockSpec((2, e_tile), lambda ni, ei, occ: (0, ei)),
                pl.BlockSpec((_ROWS, e_tile), lambda ni, ei, occ: (0, ei)),
            ],
            out_specs=pl.BlockSpec((_ROWS, n_tile), lambda ni, ei, occ: (0, ni)),
        ),
        compiler_params=pltpu.CompilerParams(
            # node tiles independent -> megacore-shardable on v7x;
            # edge axis is the reduction over the resident output block.
            dimension_semantics=("parallel", "arbitrary"),
            vmem_limit_bytes=32 * 1024 * 1024,
        ),
        cost_estimate=pl.CostEstimate(
            flops=2 * 2 * _ROWS * n_pad * e_pad,   # two sel matmuls per element
            transcendentals=0,
            bytes_accessed=bytes_accessed,
        ),
    )(occ, idx, dEdr_t)

    # Un-transpose and strip padding: (ROWS, N_pad) -> (tot_num, 3)
    return force_t[:3, :tot_num].T


def force_output_from_edge_parallel(data, energy_fn):
    """JAX analogue of ForceOutputFromEdgeParallel.forward.

    `data` holds node features (real + ghost), edge_vec, edge_idx.
    `energy_fn(edge_vec) -> scalar` stands in for the upstream model that
    produced SCALED_ENERGY from edge_vec (torch.autograd.grad equivalent).
    """
    tot_num = data["node_feature"].shape[0] + data["node_feature_ghost"].shape[0]
    edge_vec = data["edge_vec"]
    edge_idx = data["edge_idx"]
    # dE_dr = grad of summed energy w.r.t. edge vectors (jax.grad stands in for
    # torch.autograd.grad; the Pallas kernel implements the scatter hot path).
    dE_dr = jax.grad(lambda ev: jnp.sum(energy_fn(ev)))(edge_vec)
    data = dict(data)
    data["scaled_force"] = force_from_edges(dE_dr, edge_idx, tot_num)
    return data


if __name__ == "__main__":
    key = jax.random.PRNGKey(0)
    num_atoms, num_ghosts = 6, 2
    tot_num = num_atoms + num_ghosts
    num_edges = 20
    feat_dim = 16

    k1, k2, k3, k4, k5 = jax.random.split(key, 5)
    data = {
        "node_feature": jax.random.normal(k4, (num_atoms, feat_dim), jnp.float32),
        "node_feature_ghost": jax.random.normal(k5, (num_ghosts, feat_dim), jnp.float32),
        "edge_vec": jax.random.normal(k1, (num_edges, 3), jnp.float32),
        "edge_idx": jnp.stack([
            jax.random.randint(k2, (num_edges,), 0, tot_num),
            jax.random.randint(k3, (num_edges,), 0, tot_num),
        ]),
    }

    # Synthetic (deterministic) upstream energy model: E = sum(0.5*r^2 + sin(r))
    def energy_fn(edge_vec):
        return jnp.sum(0.5 * edge_vec * edge_vec + jnp.sin(edge_vec))

    out = force_output_from_edge_parallel(data, energy_fn)
    force = jax.block_until_ready(out["scaled_force"])

    # reference: pure-JAX scatter (matches torch_scatter semantics)
    dE_dr = jax.grad(lambda ev: jnp.sum(energy_fn(ev)))(data["edge_vec"])
    ref = (jnp.zeros((tot_num, 3), jnp.float32).at[data["edge_idx"][0]].add(dE_dr)
           - jnp.zeros((tot_num, 3), jnp.float32).at[data["edge_idx"][1]].add(dE_dr))
    assert force.shape == (tot_num, 3) and force.dtype == jnp.float32
    assert jnp.allclose(force, ref, atol=1e-4, rtol=1e-4), "mismatch vs reference scatter"

    print("KERNEL_OK")
</pallas_src>

<mosaic_0001>
module attributes {stable_mosaic.version = 11 : i64} {
  func.func @_scatter_force_kernel(%arg0: i32, %arg1: i32, %arg2: memref<1x1xi32, #tpu.memory_space<smem>>, %arg3: memref<2x128xi32, #tpu.memory_space<vmem>>, %arg4: memref<8x128xf32, #tpu.memory_space<vmem>>, %arg5: memref<8x128xf32, #tpu.memory_space<vmem>>) attributes {dimension_semantics = [#tpu.dimension_semantics<parallel>, #tpu.dimension_semantics<arbitrary>], iteration_bounds = array<i64: 1, 1>, scalar_prefetch = 1 : i64, scratch_operands = 0 : i64, tpu.core_type = #tpu.core_type<tc>, window_params = [{transform_indices = @transform_0, window_bounds = array<i64: 2, 128>}, {transform_indices = @transform_1, window_bounds = array<i64: 8, 128>}, {transform_indices = @transform_2, window_bounds = array<i64: 8, 128>}]} {
    %c0_i32 = arith.constant 0 : i32
    %0 = arith.cmpi eq, %arg1, %c0_i32 : i32
    %1 = arith.extui %0 : i1 to i32
    %c0_i32_0 = arith.constant 0 : i32
    %2 = arith.cmpi ne, %1, %c0_i32_0 : i32
    scf.if %2 {
      %cst = arith.constant 0.000000e+00 : f32
      %9 = vector.broadcast %cst : f32 to vector<8x128xf32>
      %c0 = arith.constant 0 : index
      %c0_3 = arith.constant 0 : index
      %10 = vector.load %arg5[%c0, %c0_3] : memref<8x128xf32, #tpu.memory_space<vmem>>, vector<8x128xf32>
      tpu.vector_store %arg5[%c0, %c0_3], %9 {strides = array<i32>} : memref<8x128xf32, #tpu.memory_space<vmem>>, vector<8x128xf32>,
    } else {
    }
    %3 = arith.index_cast %arg0 : i32 to index
    %4 = arith.index_cast %arg1 : i32 to index
    %5 = memref.load %arg2[%3, %4] : memref<1x1xi32, #tpu.memory_space<smem>>
    %c0_i32_1 = arith.constant 0 : i32
    %6 = arith.cmpi sgt, %5, %c0_i32_1 : i32
    %7 = arith.extui %6 : i1 to i32
    %c0_i32_2 = arith.constant 0 : i32
    %8 = arith.cmpi ne, %7, %c0_i32_2 : i32
    scf.if %8 {
      %9 = tpu.iota {dimensions = array<i32: 0>} : vector<128x1xi32>
      %c128_i32 = arith.constant 128 : i32
      %10 = arith.muli %arg0, %c128_i32 : i32
      %11 = vector.broadcast %10 : i32 to vector<128x1xi32>
      %12 = arith.addi %9, %11 : vector<128x1xi32>
      %c0 = arith.constant 0 : index
      %c0_3 = arith.constant 0 : index
      %13 = vector.load %arg3[%c0, %c0_3] : memref<2x128xi32, #tpu.memory_space<vmem>>, vector<1x128xi32>
      %c1 = arith.constant 1 : index
      %c0_4 = arith.constant 0 : index
      %14 = vector.load %arg3[%c1, %c0_4] : memref<2x128xi32, #tpu.memory_space<vmem>>, vector<1x128xi32>
      %c0_5 = arith.constant 0 : index
      %c0_6 = arith.constant 0 : index
      %15 = vector.load %arg4[%c0_5, %c0_6] : memref<8x128xf32, #tpu.memory_space<vmem>>, vector<8x128xf32>
      %16 = vector.broadcast %12 : vector<128x1xi32> to vector<128x128xi32>
      %17 = vector.broadcast %13 : vector<1x128xi32> to vector<128x128xi32>
      %18 = arith.cmpi eq, %16, %17 : vector<128x128xi32>
      %19 = arith.extui %18 : vector<128x128xi1> to vector<128x128xi32>
      %20 = arith.sitofp %19 : vector<128x128xi32> to vector<128x128xf32>
      %c0_7 = arith.constant 0 : index
      %c0_8 = arith.constant 0 : index
      %21 = vector.load %arg5[%c0_7, %c0_8] : memref<8x128xf32, #tpu.memory_space<vmem>>, vector<8x128xf32>
      %cst = arith.constant dense<0.000000e+00> : vector<8x128xf32>
      %22 = tpu.matmul %15, %20, %cst {dimension_numbers = #tpu.dot_dimension_numbers<[1], [1], [0], [0], [0, 0, 1, 0], [], []>, precision = #tpu.contract_precision<fp32>} : vector<8x128xf32>, vector<128x128xf32>, vector<8x128xf32> -> vector<8x128xf32>
      %23 = arith.addf %21, %22 : vector<8x128xf32>
      %c0_9 = arith.constant 0 : index
      %c0_10 = arith.constant 0 : index
      %24 = vector.load %arg5[%c0_9, %c0_10] : memref<8x128xf32, #tpu.memory_space<vmem>>, vector<8x128xf32>
      tpu.vector_store %arg5[%c0_9, %c0_10], %23 {strides = array<i32>} : memref<8x128xf32, #tpu.memory_space<vmem>>, vector<8x128xf32>,
      %25 = vector.broadcast %12 : vector<128x1xi32> to vector<128x128xi32>
      %26 = vector.broadcast %14 : vector<1x128xi32> to vector<128x128xi32>
      %27 = arith.cmpi eq, %25, %26 : vector<128x128xi32>
      %28 = arith.extui %27 : vector<128x128xi1> to vector<128x128xi32>
      %29 = arith.sitofp %28 : vector<128x128xi32> to vector<128x128xf32>
      %c0_11 = arith.constant 0 : index
      %c0_12 = arith.constant 0 : index
      %30 = vector.load %arg5[%c0_11, %c0_12] : memref<8x128xf32, #tpu.memory_space<vmem>>, vector<8x128xf32>
      %cst_13 = arith.constant dense<0.000000e+00> : vector<8x128xf32>
      %31 = tpu.matmul %15, %29, %cst_13 {dimension_numbers = #tpu.dot_dimension_numbers<[1], [1], [0], [0], [0, 0, 1, 0], [], []>, precision = #tpu.contract_precision<fp32>} : vector<8x128xf32>, vector<128x128xf32>, vector<8x128xf32> -> vector<8x128xf32>
      %32 = arith.subf %30, %31 : vector<8x128xf32>
      %c0_14 = arith.constant 0 : index
      %c0_15 = arith.constant 0 : index
      %33 = vector.load %arg5[%c0_14, %c0_15] : memref<8x128xf32, #tpu.memory_space<vmem>>, vector<8x128xf32>
      tpu.vector_store %arg5[%c0_14, %c0_15], %32 {strides = array<i32>} : memref<8x128xf32, #tpu.memory_space<vmem>>, vector<8x128xf32>,
    } else {
    }
    return
  }
  func.func @transform_0(%arg0: i32, %arg1: i32, %arg2: memref<1x1xi32, #tpu.memory_space<smem>>) -> (i32, i32) {
    %c0_i32 = arith.constant 0 : i32
    %c0_i32_0 = arith.constant 0 : i32
    return %c0_i32, %arg1 : i32, i32
  }
  func.func @transform_1(%arg0: i32, %arg1: i32, %arg2: memref<1x1xi32, #tpu.memory_space<smem>>) -> (i32, i32) {
    %c0_i32 = arith.constant 0 : i32
    %c0_i32_0 = arith.constant 0 : i32
    return %c0_i32, %arg1 : i32, i32
  }
  func.func @transform_2(%arg0: i32, %arg1: i32, %arg2: memref<1x1xi32, #tpu.memory_space<smem>>) -> (i32, i32) {
    %c0_i32 = arith.constant 0 : i32
    %c0_i32_0 = arith.constant 0 : i32
    return %c0_i32, %arg0 : i32, i32
  }
}

</mosaic_0001>

<bundles_post_ra>
// kernel: tpu_custom_call.1
= control target key start
LH: loop header
LB: loop body
LE: loop exit
PB: predicated region body
PF: predicated region fallthrough
CT: control target
= control target key end

     0   :  { %9 = vsyncpa [#allocation5], 0  ;;  %s3637_s0 = inlined_call_operand.<no memory space> [shape: s32[1,1], index: 0, kind: input, shape index: {}]   ;;  %s3638_s1 = inlined_call_operand.vmem [shape: s32[2,128], index: 1, kind: input, shape index: {}]   ;;  %s3639_s2 = inlined_call_operand.hbm [shape: f32[8,128], index: 2, kind: input, shape index: {}]   ;;  %s3640_s3 = inlined_call_operand.hbm [shape: f32[8,128], index: 3, kind: output, shape index: {}]  }
   0x1   :  { %10 = vsyncpa [#allocation6], 0  ;;  %s2592_s12 = smov [#allocation4]   ;;  %s2544_s16 = scalar_lea.hbm %s3639_s2, 128 }
   0x2   :  { %s19_s13 = sshll.u32 %s2592_s12, 4  ;;  %p2545_p0 = scmp.ne.s32.totalorder %s3639_s2, %s2544_s16  ;;  %s20_s13 = int_to_ptr.vmem [resolvable:$true] %s19_s13 }
   0x3   :  { %p2548_p1 = scmp.lt.u32.totalorder %s2544_s16, %s3639_s2 }
   0x5   :  { %p2550_p2 = pnand %p2548_p1, %p2545_p0 }
   0x7   :  { %2553 = shalt.err (!%p2550_p2)
}
   0x8   :  { %s2554_s21 = scalar_lea.vmem %s20_s13, 128  ;;  %p2559_p4 = scmp.lt.s32.totalorder %s20_s13, %s20_s13 }
   0x9   :  { %p2555_p3 = scmp.ne.s32.totalorder %s20_s13, %s2554_s21  ;;  %p2560_p5 = scmp.lt.s32.totalorder %s2554_s21, %s2554_s21 }
   0xb   :  { %p2561_p6 = por %p2560_p5, %p2559_p4 }
   0xd   :  { %p2562_p7 = pnand %p2561_p6, %p2555_p3 }
   0xf   :  { %2565 = shalt.err (!%p2562_p7)
}
  0x10   :  { %22 = dma.hbm_to_vmem [thread:$0]  %s3639_s2, 128, %s20_s13, [#allocation5]  }
  0x11   :  { %2588 = dma.done.wait [#allocation5], 128  }
  0x12   :  { %2589 = vsyncadd [#allocation5], 4294967168  ;;  %v2593_v0 = vmov 0.0   ;;  %p1484_p8 = scmp.le.s32.totalorder %s3637_s0, 0 }
  0x13   :  { %30 = vst [vmem:[#allocation7] sm:$0xff] %v2593_v0 }
  0x14   :  { %38 = sbr.rel (%p1484_p8) target bundleno = 637 (0x27d), region = 21 }
  0x1b   :  { %v39_v1 = vlaneseq  ;;  %v3671_v2 = vmov 0.0|0.0   ;;  %v2639_v3 = vld [vmem:[%s3638_s1] ss:$0 sm:$0xff]  ;;  %v2646_v5 = vld [vmem:[%s3638_s1 + $0x1] ss:$0 sm:$0xff]  ;;  %vm3641_vm0 = vmmov 0  }
  0x1c   :  { %2239 = vmatprep.subr.bf16.mxu1 %v3671_v2  ;;  %2383 = vmatprep.subr.bf16.mxu0 %v3671_v2  ;;  %v3675_v6 = vmov 0.0   ;;  %v3669_v11 = vmov 1.0|1.0   ;;  %v3723_v25 = vmov 0  ;;  %v3725_v36 = vmov 0  ;;  %v2884_v42 = vld [vmem:[#allocation4] sm:$0xff] }
  0x1d   :  { %v2641_v4 = vshrl.u32 %v39_v1, 7  ;;  %1851 = vmatprep.mubr.msk.f32.mxu1 %vm3641_vm0, %v3675_v6  ;;  %2061 = vmatprep.mubr.msk.f32.mxu0 %vm3641_vm0, %v3675_v6  ;;  %v3728_v39 = vmov 0  ;;  %v2909_v49 = vand.u32 4294901760, %v2884_v42  ;;  %v3739_v62 = vmov 0 }
  0x1e   :  { %v3744_v1 = vmov 0 }
  0x1f   :  { %v41_v7 = vadd.s32 8, %v2641_v4  ;;  %vm81_vm1 = vcmp.eq.s32.totalorder %v2641_v4, %v2639_v3  ;;  %vm777_vm2 = vcmp.eq.s32.totalorder %v2641_v4, %v2646_v5  ;;  %v2660_v8 = vadd.s32 16, %v2641_v4 }
  0x20   :  { %v2663_v9 = vadd.s32 24, %v2641_v4  ;;  %v2720_v15 = vadd.s32 32, %v2641_v4  ;;  %v2723_v16 = vadd.s32 40, %v2641_v4  ;;  %v2762_v19 = vadd.s32 48, %v2641_v4 }
  0x21   :  { %vm82_vm3 = vcmp.eq.s32.totalorder %v41_v7, %v2639_v3  ;;  %vm778_vm4 = vcmp.eq.s32.totalorder %v41_v7, %v2646_v5  ;;  %vm83_vm7 = vcmp.eq.s32.totalorder %v2660_v8, %v2639_v3  ;;  %vm3644_vm9 = vcmp.eq.s32.totalorder %v2660_v8, %v2646_v5 }
  0x22   :  { %vm2670_vm5 = vmpackc.low %vm82_vm3, %vm81_vm1  ;;  %vm3649_vm8 = vcmp.eq.s32.totalorder %v2663_v9, %v2639_v3  ;;  %vm3643_vm10 = vcmp.eq.s32.totalorder %v2663_v9, %v2646_v5  ;;  %vm3648_vm13 = vcmp.eq.s32.totalorder %v2720_v15, %v2639_v3  ;;  %vm3647_vm14 = vcmp.eq.s32.totalorder %v2723_v16, %v2639_v3 }
  0x23   :  { %2241 = vmatpush3.bf16.xpose.msk.msra.mxu1 %vm2670_vm5, %v3669_v11  ;;  %vm2682_vm6 = vmpackc.low %vm778_vm4, %vm777_vm2  ;;  %vm3646_vm15 = vcmp.eq.s32.totalorder %v2720_v15, %v2646_v5  ;;  %vm3645_vm0 = vcmp.eq.s32.totalorder %v2723_v16, %v2646_v5  ;;  %v2765_v20 = vadd.s32 56, %v2641_v4  ;;  %v1486_v21 = vsel %vm81_vm1, 1.0, %v3675_v6 }
  0x24   :  { %2385 = vmatpush3.bf16.xpose.msk.msra.mxu0 %vm2682_vm6, %v3669_v11  ;;  %2242 = vmatprep.subr.bf16.mxu1 %v3671_v2  ;;  %vm2705_vm11 = vmpackc.low %vm3649_vm8, %vm83_vm7  ;;  %v2797_v23 = vsub.f32 %v1486_v21, %v1486_v21  ;;  %v1551_v24 = vsel %vm777_vm2, 1.0, %v3675_v6  ;;  %v2814_v26 = vadd.s32 64, %v2641_v4  ;;  %v2817_v27 = vadd.s32 72, %v2641_v4 }
  0x25   :  { %2386 = vmatprep.subr.bf16.mxu0 %v3671_v2  ;;  %vm2715_vm12 = vmpackc.low %vm3643_vm10, %vm3644_vm9  ;;  %v1487_v28 = vsel %vm82_vm3, 1.0, %v3675_v6  ;;  %v1552_v29 = vsel %vm778_vm4, 1.0, %v3675_v6  ;;  %v2828_v30 = vsub.f32 %v1551_v24, %v1551_v24  ;;  %v1488_v35 = vsel %vm83_vm7, 1.0, %v3675_v6 }
  0x26   :  { %vm2747_vm10 = vmpackc.low %vm3647_vm14, %vm3648_vm13  ;;  %vm3651_vm14 = vcmp.eq.s32.totalorder %v2762_v19, %v2646_v5  ;;  %vm3650_vm13 = vcmp.eq.s32.totalorder %v2765_v20, %v2646_v5  ;;  %v3668_v31 = vand.u32 4294901760, %v2797_v23  ;;  %vm3656_vm2 = vcmp.eq.s32.totalorder %v2814_v26, %v2639_v3 }
  0x27   :  { %vm2757_vm9 = vmpackc.low %vm3645_vm0, %vm3646_vm15  ;;  %vm87_vm0 = vcmp.eq.s32.totalorder %v2762_v19, %v2639_v3  ;;  %vm3652_vm15 = vcmp.eq.s32.totalorder %v2765_v20, %v2639_v3  ;;  %vm3655_vm3 = vcmp.eq.s32.totalorder %v2817_v27, %v2639_v3  ;;  %v2840_v32 = vsub.f32 %v1487_v28, %v1487_v28 }
  0x28   :  { %vm2793_vm8 = vmpackc.low %vm3652_vm15, %vm87_vm0  ;;  %v2842_v33 = vsub.f32 %v1552_v29, %v1552_v29  ;;  %vm3654_vm4 = vcmp.eq.s32.totalorder %v2814_v26, %v2646_v5  ;;  %v3664_v34 = vand.u32 4294901760, %v2828_v30  ;;  %v2866_v37 = vsub.f32 %v2797_v23, %v3668_v31 }
  0x29   :  { %vm2809_vm1 = vmpackc.low %vm3650_vm13, %vm3651_vm14  ;;  %vm3653_vm13 = vcmp.eq.s32.totalorder %v2817_v27, %v2646_v5  ;;  %vm3727_vm15 = vcmp.eq.s32.totalorder %v2663_v9, %v2639_v3  ;;  %v50_v40 = vadd.s32 80, %v2641_v4  ;;  %v51_v41 = vadd.s32 88, %v2641_v4 }
  0x2a   :  { %v3724_v25 = vsel %vm2809_vm1, 4294967295, %v3723_v25  ;;  %vm2859_vm14 = vmpackc.low %vm3655_vm3, %vm3656_vm2  ;;  %v1489_v38 = vsel %vm3727_vm15, 1.0, %v3675_v6  ;;  %v3667_v43 = vand.u32 4294901760, %v2840_v32  ;;  %v3663_v44 = vand.u32 4294901760, %v2842_v33 }
  0x2b   :  { %2244 = vmatpush3.bf16.xpose.msk.msra.mxu1 %vm2705_vm11, %v3669_v11  ;;  %v3726_v36 = vsel %vm2859_vm14, 4294967295, %v3725_v36  ;;  %vm2878_vm7 = vmpackc.low %vm3653_vm13, %vm3654_vm4  ;;  %v2888_v45 = vsub.f32 %v1488_v35, %v1488_v35  ;;  %v2896_v46 = vsub.f32 %v2828_v30, %v3664_v34  ;;  %v2898_v47 = vsub.f32 %v1489_v38, %v1489_v38 }
  0x2c   :  { %2388 = vmatpush3.bf16.xpose.msk.msra.mxu0 %vm2715_vm12, %v3669_v11  ;;  %2245 = vmatprep.subr.bf16.mxu1 %v3671_v2  ;;  %v3729_v39 = vsel %vm2878_vm7, 4294967295, %v3728_v39  ;;  %vm3730_vm15 = vcmp.eq.s32.totalorder %v2660_v8, %v2646_v5  ;;  %vm3731_vm13 = vcmp.eq.s32.totalorder %v2663_v9, %v2646_v5  ;;  %v2922_v52 = vsub.f32 %v2840_v32, %v3667_v43 }
  0x2d   :  { %2389 = vmatprep.subr.bf16.mxu0 %v3671_v2  ;;  %v1553_v48 = vsel %vm3730_vm15, 1.0, %v3675_v6  ;;  %v1554_v51 = vsel %vm3731_vm13, 1.0, %v3675_v6  ;;  %v2927_v53 = vsub.f32 %v2842_v33, %v3663_v44  ;;  %vm3732_vm2 = vcmp.eq.s32.totalorder %v2720_v15, %v2639_v3 }
  0x2e   :  { %v1490_v55 = vsel %vm3732_vm2, 1.0, %v3675_v6  ;;  %vm3733_vm4 = vcmp.eq.s32.totalorder %v2723_v16, %v2639_v3  ;;  %vm3734_vm15 = vcmp.eq.s32.totalorder %v2720_v15, %v2646_v5  ;;  %vm3735_vm13 = vcmp.eq.s32.totalorder %v2723_v16, %v2646_v5 }
  0x2f   :  { %v1491_v56 = vsel %vm3733_vm4, 1.0, %v3675_v6  ;;  %v1555_v57 = vsel %vm3734_vm15, 1.0, %v3675_v6  ;;  %v1556_v59 = vsel %vm3735_vm13, 1.0, %v3675_v6  ;;  %v1492_v60 = vsel %vm87_vm0, 1.0, %v3675_v6 }
  0x30   :  { %vm3736_vm2 = vcmp.eq.s32.totalorder %v2765_v20, %v2639_v3  ;;  %vm3737_vm4 = vcmp.eq.s32.totalorder %v50_v40, %v2639_v3  ;;  %vm3738_vm15 = vcmp.eq.s32.totalorder %v51_v41, %v2639_v3  ;;  %v2965_v63 = vsub.f32 %v1553_v48, %v1553_v48 }
  0x31   :  { %v1493_v61 = vsel %vm3736_vm2, 1.0, %v3675_v6  ;;  %vm2961_vm3 = vmpackc.low %vm3738_vm15, %vm3737_vm4  ;;  %vm3741_vm13 = vcmp.eq.s32.totalorder %v2762_v19, %v2646_v5  ;;  %vm3742_vm0 = vcmp.eq.s32.totalorder %v50_v40, %v2646_v5  ;;  %v52_v7 = vadd.s32 96, %v2641_v4 }
  0x32   :  { %v3740_v62 = vsel %vm2961_vm3, 4294967295, %v3739_v62  ;;  %v1557_v0 = vsel %vm3741_vm13, 1.0, %v3675_v6  ;;  %v53_v8 = vadd.s32 104, %v2641_v4  ;;  %v2981_v9 = vsub.f32 %v1554_v51, %v1554_v51 }
  0x33   :  { %2247 = vmatpush3.bf16.xpose.msk.msra.mxu1 %vm2747_vm10, %v3669_v11  ;;  %v2983_v15 = vsub.f32 %v1490_v55, %v1490_v55  ;;  %v2985_v16 = vsub.f32 %v1491_v56, %v1491_v56  ;;  %v2987_v19 = vsub.f32 %v1555_v57, %v1555_v57  ;;  %v2989_v21 = vsub.f32 %v1556_v59, %v1556_v59 }
  0x34   :  { %2391 = vmatpush3.bf16.xpose.msk.msra.mxu0 %vm2757_vm9, %v3669_v11  ;;  %2248 = vmatprep.subr.bf16.mxu1 %v3671_v2  ;;  %v2991_v24 = vsub.f32 %v1492_v60, %v1492_v60  ;;  %v2993_v28 = vsub.f32 %v1493_v61, %v1493_v61  ;;  %v3002_v35 = vsub.f32 %v1557_v0, %v1557_v0  ;;  %v54_v59 = vadd.s32 112, %v2641_v4 }
  0x35   :  { %2392 = vmatprep.subr.bf16.mxu0 %v3671_v2  ;;  %vm3748_vm4 = vcmp.eq.s32.totalorder %v2814_v26, %v2639_v3  ;;  %vm3749_vm15 = vcmp.eq.s32.totalorder %v2817_v27, %v2639_v3  ;;  %vm3750_vm13 = vcmp.eq.s32.totalorder %v2814_v26, %v2646_v5  ;;  %v55_v60 = vadd.s32 120, %v2641_v4 }
  0x36   :  { %v1494_v38 = vsel %vm3748_vm4, 1.0, %v3675_v6  ;;  %v1495_v48 = vsel %vm3749_vm15, 1.0, %v3675_v6  ;;  %vm93_vm4 = vcmp.eq.s32.totalorder %v52_v7, %v2639_v3  ;;  %vm94_vm15 = vcmp.eq.s32.totalorder %v53_v8, %v2639_v3 }
  0x37   :  { %v3045_v61 = vsub.f32 %v1494_v38, %v1494_v38  ;;  %v3047_v0 = vsub.f32 %v1495_v48, %v1495_v48  ;;  %v3759_v38 = vmov 0  ;;  %v3077_v48 = vsub.f32 %v2884_v42, %v2909_v49 }
  0x39   :  { %v3122_v58 = vand.u32 4294901760, %v3077_v48 }
  0x3b   :  { %2250 = vmatpush3.bf16.xpose.msk.msra.mxu1 %vm2793_vm8, %v3669_v11  ;;  %3762 = vst [vmem:[#allocation13_spill] sm:$0xff] %v3122_v58 }
  0x3c   :  { %2394 = vmatpush3.bf16.xpose.msk.msra.mxu0 %vm2809_vm1, %v3669_v11  ;;  %2251 = vmatprep.subr.bf16.mxu1 %v3671_v2 }
  0x3d   :  { %2395 = vmatprep.subr.bf16.mxu0 %v3671_v2 }
  0x43   :  { %2253 = vmatpush3.bf16.xpose.msk.msra.mxu1 %vm2859_vm14, %v3669_v11  ;;  %vm791_vm14 = vcmp.eq.s32.totalorder %v54_v59, %v2646_v5 }
  0x44   :  { %2397 = vmatpush3.bf16.xpose.msk.msra.mxu0 %vm2878_vm7, %v3669_v11  ;;  %2254 = vmatprep.subr.bf16.mxu1 %v3671_v2  ;;  %vm3743_vm7 = vcmp.eq.s32.totalorder %v51_v41, %v2646_v5 }
  0x45   :  { %2398 = vmatprep.subr.bf16.mxu0 %v3671_v2  ;;  %vm2975_vm2 = vmpackc.low %vm3743_vm7, %vm3742_vm0  ;;  %vm3747_vm7 = vcmp.eq.s32.totalorder %v2765_v20, %v2646_v5  ;;  %v1559_v20 = vsel %vm3750_vm13, 1.0, %v3675_v6  ;;  %vm3751_vm0 = vcmp.eq.s32.totalorder %v2817_v27, %v2646_v5  ;;  %vm3753_vm13 = vcmp.eq.s32.totalorder %v51_v41, %v2639_v3 }
  0x46   :  { %v3745_v1 = vsel %vm2975_vm2, 4294967295, %v3744_v1  ;;  %v1558_v29 = vsel %vm3747_vm7, 1.0, %v3675_v6  ;;  %v1560_v51 = vsel %vm3751_vm0, 1.0, %v3675_v6  ;;  %vm3752_vm7 = vcmp.eq.s32.totalorder %v50_v40, %v2639_v3 }
  0x47   :  { %3746 = vst [vmem:[#allocation10_spill] sm:$0xff] %v3745_v1  ;;  %v1496_v55 = vsel %vm3752_vm7, 1.0, %v3675_v6  ;;  %v1497_v26 = vsel %vm3753_vm13, 1.0, %v3675_v6  ;;  %vm789_vm0 = vcmp.eq.s32.totalorder %v52_v7, %v2646_v5  ;;  %v3038_v27 = vsub.f32 %v1558_v29, %v1558_v29 }
  0x48   :  { %vm3755_vm7 = vcmp.eq.s32.totalorder %v51_v41, %v2646_v5  ;;  %v3051_v44 = vsub.f32 %v1560_v51, %v1560_v51  ;;  %v3756_v29 = vmov 0  ;;  %v3061_v41 = vsub.f32 %v1496_v55, %v1496_v55 }
  0x49   :  { %v1562_v57 = vsel %vm3755_vm7, 1.0, %v3675_v6  ;;  %v3063_v34 = vsub.f32 %v1497_v26, %v1497_v26  ;;  %v1498_v51 = vsel %vm93_vm4, 1.0, %v3675_v6  ;;  %v1499_v55 = vsel %vm94_vm15, 1.0, %v3675_v6 }
  0x4a   :  { %v1563_v26 = vsel %vm789_vm0, 1.0, %v3675_v6  ;;  %vm95_vm7 = vcmp.eq.s32.totalorder %v54_v59, %v2639_v3  ;;  %v3115_v43 = vsub.f32 %v1499_v55, %v1499_v55  ;;  %v3693_v1 = vand.u32 4294901760, %v3002_v35 }
  0x4b   :  { %2256 = vmatpush3.bf16.xpose.msk.msra.mxu1 %vm2961_vm3, %v3669_v11  ;;  %vm790_vm3 = vcmp.eq.s32.totalorder %v53_v8, %v2646_v5  ;;  %v1500_v7 = vsel %vm95_vm7, 1.0, %v3675_v6  ;;  %v3124_v54 = vsub.f32 %v1563_v26, %v1563_v26  ;;  %v3763_v26 = vmov 0 }
  0x4c   :  { %2400 = vmatpush3.bf16.xpose.msk.msra.mxu0 %vm2975_vm2, %v3669_v11  ;;  %2257 = vmatprep.subr.bf16.mxu1 %v3671_v2  ;;  %vm3754_vm2 = vcmp.eq.s32.totalorder %v50_v40, %v2646_v5  ;;  %v3049_v40 = vsub.f32 %v1559_v20, %v1559_v20  ;;  %vm3071_vm13 = vmpackc.low %vm790_vm3, %vm789_vm0  ;;  %v3079_v20 = vsub.f32 %v1562_v57, %v1562_v57  ;;  %v1564_v42 = vsel %vm790_vm3, 1.0, %v3675_v6 }
  0x4d   :  { %2401 = vmatprep.subr.bf16.mxu0 %v3671_v2  ;;  %v1561_v56 = vsel %vm3754_vm2, 1.0, %v3675_v6  ;;  %vm3057_vm2 = vmpackc.low %vm94_vm15, %vm93_vm4  ;;  %v3760_v38 = vsel %vm3071_vm13, 4294967295, %v3759_v38  ;;  %vm96_vm4 = vcmp.eq.s32.totalorder %v55_v60, %v2639_v3  ;;  %vm792_vm3 = vcmp.eq.s32.totalorder %v55_v60, %v2646_v5 }
  0x4e   :  { %v3757_v29 = vsel %vm3057_vm2, 4294967295, %v3756_v29  ;;  %v3065_v4 = vsub.f32 %v1561_v56, %v1561_v56  ;;  %3761 = vst [vmem:[#allocation12_spill] sm:$0xff] %v3760_v38  ;;  %v1501_v8 = vsel %vm96_vm4, 1.0, %v3675_v6  ;;  %v1565_v56 = vsel %vm791_vm14, 1.0, %v3675_v6  ;;  %vm3144_vm15 = vmpackc.low %vm96_vm4, %vm95_vm7 }
  0x4f   :  { %3758 = vst [vmem:[#allocation11_spill] sm:$0xff] %v3757_v29  ;;  %v3113_v57 = vsub.f32 %v1498_v51, %v1498_v51  ;;  %v1566_v31 = vsel %vm792_vm3, 1.0, %v3675_v6  ;;  %v3126_v50 = vsub.f32 %v1564_v42, %v1564_v42  ;;  %v3132_v55 = vsub.f32 %v1500_v7, %v1500_v7  ;;  %vm3160_vm0 = vmpackc.low %vm792_vm3, %vm791_vm14 }
  0x50   :  { %v3136_v38 = vsub.f32 %v1565_v56, %v1565_v56  ;;  %v3764_v26 = vsel %vm3144_vm15, 4294967295, %v3763_v26  ;;  %v3148_v42 = vsub.f32 %v1566_v31, %v1566_v31  ;;  %v3766_v3 = vmov 0 }
  0x51   :  { %3765 = vst [vmem:[#allocation14_spill] sm:$0xff] %v3764_v26  ;;  %v3767_v3 = vsel %vm3160_vm0, 4294967295, %v3766_v3  ;;  %v214_v31 = vsub.f32 %v3077_v48, %v3122_v58  ;;  %v233_v7 = vand.u32 4294901760, %v2922_v52  ;;  %v3769_v51 = vmov 1.0|1.0  }
  0x52   :  { %3768 = vst [vmem:[#allocation15_spill] sm:$0xff] %v3767_v3  ;;  %v922_v60 = vand.u32 4294901760, %v2896_v46  ;;  %v3771_v56 = vand.u32 4294901760, %v2866_v37  ;;  %v3772_v46 = vand.u32 4294901760, %v2888_v45  ;;  %v3773_v6 = vand.u32 4294901760, %v2898_v47 }
  0x53   :  { %2259 = vmatpush3.bf16.xpose.msk.msra.mxu1 %vm3057_vm2, %v3669_v11  ;;  %v215_v59 = vand.u32 4294901760, %v214_v31  ;;  %v3774_v3 = vand.u32 4294901760, %v2965_v63  ;;  %v3775_v29 = vand.u32 4294901760, %v2981_v9  ;;  %v3685_v37 = vand.u32 4294901760, %v2983_v15 }
  0x54   :  { %2403 = vmatpush3.bf16.xpose.msk.msra.mxu0 %vm3071_vm13, %v3669_v11  ;;  %2260 = vmatprep.subr.bf16.mxu1 %v3671_v2  ;;  %v3770_v11 = vmov 0.0|0.0   ;;  %v2264_v5 = vpack.c.bf16 %v233_v7, %v3771_v56  ;;  %v246_v52 = vsub.f32 %v2898_v47, %v3773_v6  ;;  %v3688_v7 = vand.u32 4294901760, %v2985_v16 }
  0x55   :  { %2404 = vmatprep.subr.bf16.mxu0 %v3671_v2  ;;  %v3134_v2 = vsub.f32 %v1501_v8, %v1501_v8  ;;  %v929_v8 = vand.u32 4294901760, %v2927_v53  ;;  %v239_v53 = vsub.f32 %v2888_v45, %v3772_v46  ;;  %v935_v26 = vsub.f32 %v2965_v63, %v3774_v3 }
  0x56   :  { %v942_v31 = vsub.f32 %v2981_v9, %v3775_v29  ;;  %v247_v46 = vand.u32 4294901760, %v246_v52  ;;  %v3689_v6 = vand.u32 4294901760, %v2987_v19  ;;  %v3776_v29 = vmov 0.0  }
  0x57   :  { %v2408_v58 = vpack.c.bf16 %v929_v8, %v922_v60  ;;  %v240_v56 = vand.u32 4294901760, %v239_v53  ;;  %v3690_v8 = vand.u32 4294901760, %v2989_v21  ;;  %v936_v3 = vand.u32 4294901760, %v935_v26 }
  0x58   :  { %v943_v60 = vand.u32 4294901760, %v942_v31  ;;  %vm3777_vm14 = vmmov 0   ;;  %v949_v26 = vsub.f32 %v2987_v19, %v3689_v6  ;;  %v3691_v31 = vand.u32 4294901760, %v2991_v24 }
  0x59   :  { %v956_v53 = vsub.f32 %v2989_v21, %v3690_v8  ;;  %vm3794_vm7 = vnez %v3726_v36  ;;  %vm3795_vm4 = vnez %v3729_v39  ;;  %vm3796_vm3 = vnez %v3740_v62 }
  0x5a   :  { %v2411_v52 = vpack.c.bf16 %v943_v60, %v936_v3  ;;  %v950_v3 = vand.u32 4294901760, %v949_v26  ;;  %v267_v8 = vsub.f32 %v2991_v24, %v3691_v31  ;;  %v3695_v26 = vand.u32 4294901760, %v3045_v61 }
  0x5b   :  { %2262 = vmatpush3.bf16.xpose.msk.msra.mxu1 %vm3144_vm15, %v3769_v51  ;;  %v957_v60 = vand.u32 4294901760, %v956_v53  ;;  %v3697_v31 = vand.u32 4294901760, %v3049_v40 }
  0x5c   :  { %2406 = vmatpush3.bf16.xpose.msk.msra.mxu0 %vm3160_vm0, %v3769_v51  ;;  %2263 = vmatprep.subr.bf16.mxu1 %v3770_v11  ;;  %v268_v53 = vand.u32 4294901760, %v267_v8 }
  0x5d   :  { %2407 = vmatprep.subr.bf16.mxu0 %v3770_v11 }
  0x62   :  { %1852 = vmatmul.mubr.f32.vlgmr.msra.gmra.mrb[0].mxu1 %v215_v59 }
  0x63   :  { %2265 = vmatpush3.bf16.xpose.msra.mxu1 %v2264_v5  ;;  %2062 = vmatmul.mubr.f32.vlgmr.msra.gmra.mrb[0].mxu0 %v215_v59  ;;  %v2267_v59 = vpack.c.bf16 %v247_v46, %v240_v56  ;;  %v253_v5 = vsub.f32 %v2983_v15, %v3685_v37  ;;  %v3692_v56 = vand.u32 4294901760, %v2993_v28 }
  0x64   :  { %2409 = vmatpush3.bf16.xpose.msra.mxu0 %v2408_v58  ;;  %2266 = vmatprep.subr.bf16.mxu1 %v3770_v11  ;;  %v260_v58 = vsub.f32 %v2985_v16, %v3688_v7  ;;  %v3694_v7 = vand.u32 4294901760, %v3038_v27 }
  0x65   :  { %2410 = vmatprep.subr.bf16.mxu0 %v3770_v11  ;;  %1886 = vmatprep.mubr.msk.f32.mxu1 %vm3777_vm14, %v3776_v29  ;;  %v254_v46 = vand.u32 4294901760, %v253_v5  ;;  %v2414_v5 = vpack.c.bf16 %v957_v60, %v950_v3 }
  0x66   :  { %2096 = vmatprep.mubr.msk.f32.mxu0 %vm3777_vm14, %v3776_v29  ;;  %v261_v37 = vand.u32 4294901760, %v260_v58  ;;  %v963_v58 = vsub.f32 %v3002_v35, %v3693_v1 }
  0x68   :  { %v2270_v6 = vpack.c.bf16 %v261_v37, %v254_v46  ;;  %v3696_v37 = vand.u32 4294901760, %v3047_v0  ;;  %v964_v3 = vand.u32 4294901760, %v963_v58  ;;  %v3699_v58 = vand.u32 4294901760, %v3061_v41 }
  0x6b   :  { %2268 = vmatpush3.bf16.xpose.msra.mxu1 %v2267_v59  ;;  %v274_v59 = vsub.f32 %v2993_v28, %v3692_v56  ;;  %v3698_v56 = vand.u32 4294901760, %v3051_v44 }
  0x6c   :  { %2412 = vmatpush3.bf16.xpose.msra.mxu0 %v2411_v52  ;;  %2269 = vmatprep.subr.bf16.mxu1 %v3770_v11  ;;  %v970_v52 = vsub.f32 %v3038_v27, %v3694_v7  ;;  %v281_v7 = vsub.f32 %v3045_v61, %v3695_v26  ;;  %v3701_v26 = vand.u32 4294901760, %v3065_v4 }
  0x6d   :  { %2413 = vmatprep.subr.bf16.mxu0 %v3770_v11  ;;  %v275_v46 = vand.u32 4294901760, %v274_v59  ;;  %v977_v59 = vsub.f32 %v3049_v40, %v3697_v31 }
  0x6e   :  { %v971_v60 = vand.u32 4294901760, %v970_v52  ;;  %v3700_v52 = vand.u32 4294901760, %v3063_v34 }
  0x6f   :  { %v2273_v1 = vpack.c.bf16 %v275_v46, %v268_v53  ;;  %v282_v53 = vand.u32 4294901760, %v281_v7 }
  0x70   :  { %v2417_v8 = vpack.c.bf16 %v971_v60, %v964_v3  ;;  %v978_v3 = vand.u32 4294901760, %v977_v59  ;;  %v3703_v59 = vand.u32 4294901760, %v3113_v57 }
  0x73   :  { %2271 = vmatpush3.bf16.xpose.msra.mxu1 %v2270_v6  ;;  %v288_v6 = vsub.f32 %v3047_v0, %v3696_v37  ;;  %v3702_v37 = vand.u32 4294901760, %v3079_v20 }
  0x74   :  { %2415 = vmatpush3.bf16.xpose.msra.mxu0 %v2414_v5  ;;  %2272 = vmatprep.subr.bf16.mxu1 %v3770_v11  ;;  %v984_v5 = vsub.f32 %v3051_v44, %v3698_v56  ;;  %v295_v56 = vsub.f32 %v3061_v41, %v3699_v58  ;;  %v3705_v58 = vand.u32 4294901760, %v3124_v54 }
  0x75   :  { %2416 = vmatprep.subr.bf16.mxu0 %v3770_v11  ;;  %v289_v46 = vand.u32 4294901760, %v288_v6  ;;  %v991_v6 = vsub.f32 %v3065_v4, %v3701_v26 }
  0x76   :  { %v985_v60 = vand.u32 4294901760, %v984_v5  ;;  %v3704_v5 = vand.u32 4294901760, %v3115_v43 }
  0x77   :  { %v2276_v31 = vpack.c.bf16 %v289_v46, %v282_v53  ;;  %v296_v53 = vand.u32 4294901760, %v295_v56 }
  0x78   :  { %v2420_v7 = vpack.c.bf16 %v985_v60, %v978_v3  ;;  %v992_v3 = vand.u32 4294901760, %v991_v6  ;;  %v322_v6 = vand.u32 4294901760, %v3132_v55 }
  0x7b   :  { %2274 = vmatpush3.bf16.xpose.msra.mxu1 %v2273_v1  ;;  %v302_v1 = vsub.f32 %v3063_v34, %v3700_v52  ;;  %v3706_v52 = vand.u32 4294901760, %v3126_v50 }
  0x7c   :  { %2418 = vmatpush3.bf16.xpose.msra.mxu0 %v2417_v8  ;;  %2275 = vmatprep.subr.bf16.mxu1 %v3770_v11  ;;  %v998_v8 = vsub.f32 %v3079_v20, %v3702_v37  ;;  %v309_v37 = vsub.f32 %v3113_v57, %v3703_v59  ;;  %v1018_v59 = vand.u32 4294901760, %v3136_v38 }
  0x7d   :  { %2419 = vmatprep.subr.bf16.mxu0 %v3770_v11  ;;  %v303_v46 = vand.u32 4294901760, %v302_v1  ;;  %v1005_v1 = vsub.f32 %v3124_v54, %v3705_v58 }
  0x7e   :  { %v999_v60 = vand.u32 4294901760, %v998_v8  ;;  %v3707_v8 = vand.u32 4294901760, %v3134_v2 }
  0x7f   :  { %v2279_v26 = vpack.c.bf16 %v303_v46, %v296_v53  ;;  %v310_v53 = vand.u32 4294901760, %v309_v37 }
  0x80   :  { %v2423_v56 = vpack.c.bf16 %v999_v60, %v992_v3  ;;  %v1006_v3 = vand.u32 4294901760, %v1005_v1 }
  0x83   :  { %2277 = vmatpush3.bf16.xpose.msra.mxu1 %v2276_v31  ;;  %v316_v31 = vsub.f32 %v3115_v43, %v3704_v5  ;;  %v1025_v5 = vand.u32 4294901760, %v3148_v42 }
  0x84   :  { %2421 = vmatpush3.bf16.xpose.msra.mxu0 %v2420_v7  ;;  %2278 = vmatprep.subr.bf16.mxu1 %v3770_v11  ;;  %v1012_v7 = vsub.f32 %v3126_v50, %v3706_v52  ;;  %v323_v52 = vsub.f32 %v3132_v55, %v322_v6 }
  0x85   :  { %2422 = vmatprep.subr.bf16.mxu0 %v3770_v11  ;;  %v317_v46 = vand.u32 4294901760, %v316_v31  ;;  %v1019_v31 = vsub.f32 %v3136_v38, %v1018_v59 }
  0x86   :  { %v1013_v60 = vand.u32 4294901760, %v1012_v7  ;;  %v324_v1 = vand.u32 4294901760, %v323_v52  ;;  %v3779_v52 = vpack.c.bf16 %v2842_v33, %v2828_v30 }
  0x87   :  { %v2282_v58 = vpack.c.bf16 %v317_v46, %v310_v53  ;;  %v1020_v53 = vand.u32 4294901760, %v1019_v31  ;;  %v3784_v31 = vpack.c.bf16 %v2993_v28, %v2991_v24 }
  0x88   :  { %v2426_v37 = vpack.c.bf16 %v1013_v60, %v1006_v3  ;;  %v3781_v60 = vpack.c.bf16 %v2981_v9, %v2965_v63 }
  0x8b   :  { %2280 = vmatpush3.bf16.xpose.msra.mxu1 %v2279_v26  ;;  %v330_v26 = vsub.f32 %v3134_v2, %v3707_v8 }
  0x8c   :  { %2424 = vmatpush3.bf16.xpose.msra.mxu0 %v2423_v56  ;;  %2281 = vmatprep.subr.bf16.mxu1 %v3770_v11  ;;  %v1026_v56 = vsub.f32 %v3148_v42, %v1025_v5 }
  0x8d   :  { %2425 = vmatprep.subr.bf16.mxu0 %v3770_v11  ;;  %v331_v7 = vand.u32 4294901760, %v330_v26  ;;  %v3782_v26 = vpack.c.bf16 %v2985_v16, %v2983_v15 }
  0x8e   :  { %v1027_v46 = vand.u32 4294901760, %v1026_v56  ;;  %v3785_v56 = vpack.c.bf16 %v3038_v27, %v3002_v35 }
  0x8f   :  { %v2285_v8 = vpack.c.bf16 %v331_v7, %v324_v1  ;;  %v3786_v1 = vpack.c.bf16 %v3047_v0, %v3045_v61  ;;  %v3787_v7 = vpack.c.bf16 %v3051_v44, %v3049_v40 }
  0x90   :  { %v2429_v3 = vpack.c.bf16 %v1027_v46, %v1020_v53  ;;  %v3788_v53 = vpack.c.bf16 %v3063_v34, %v3061_v41  ;;  %v3789_v46 = vpack.c.bf16 %v3079_v20, %v3065_v4 }
  0x93   :  { %2283 = vmatpush3.bf16.xpose.msra.mxu1 %v2282_v58  ;;  %v3778_v58 = vpack.c.bf16 %v2840_v32, %v2797_v23 }
  0x94   :  { %2427 = vmatpush3.bf16.xpose.msra.mxu0 %v2426_v37  ;;  %2284 = vmatprep.subr.bf16.mxu1 %v3770_v11  ;;  %v3783_v37 = vpack.c.bf16 %v2989_v21, %v2987_v19 }
  0x95   :  { %2428 = vmatprep.subr.bf16.mxu0 %v3770_v11 }
  0x9b   :  { %2286 = vmatpush3.bf16.xpose.msra.mxu1 %v2285_v8  ;;  %v3780_v8 = vpack.c.bf16 %v2898_v47, %v2888_v45 }
  0x9c   :  { %2430 = vmatpush3.bf16.xpose.msra.mxu0 %v2429_v3  ;;  %2287 = vmatprep.subr.bf16.mxu1 %v3770_v11  ;;  %v3790_v3 = vpack.c.bf16 %v3115_v43, %v3113_v57 }
  0x9d   :  { %2431 = vmatprep.subr.bf16.mxu0 %v3770_v11 }
  0xa2   :  { %1887 = vmatmul.mubr.f32.vlgmr.msra.gmra.mrb[2].mxu1 %v2909_v49 }
  0xa3   :  { %2289 = vmatpush3.bf16.xpose.msra.mxu1 %v3778_v58  ;;  %2097 = vmatmul.mubr.f32.vlgmr.msra.gmra.mrb[0].mxu0 %v2909_v49  ;;  %v3791_v58 = vpack.c.bf16 %v3126_v50, %v3124_v54 }
  0xa4   :  { %2433 = vmatpush3.bf16.xpose.msra.mxu0 %v3779_v52  ;;  %2290 = vmatprep.subr.bf16.mxu1 %v3770_v11  ;;  %v3792_v52 = vpack.c.bf16 %v3134_v2, %v3132_v55 }
  0xa5   :  { %2434 = vmatprep.subr.bf16.mxu0 %v3770_v11  ;;  %1921 = vmatprep.mubr.msk.f32.mxu1 %vm3777_vm14, %v3776_v29 }
  0xa6   :  { %2131 = vmatprep.mubr.msk.f32.mxu0 %vm3777_vm14, %v3776_v29 }
  0xab   :  { %2292 = vmatpush3.bf16.xpose.msra.mxu1 %v3780_v8  ;;  %v3793_v8 = vpack.c.bf16 %v3148_v42, %v3136_v38 }
  0xac   :  { %2436 = vmatpush3.bf16.xpose.msra.mxu0 %v3781_v60  ;;  %2293 = vmatprep.subr.bf16.mxu1 %v3770_v11 }
  0xad   :  { %2437 = vmatprep.subr.bf16.mxu0 %v3770_v11 }
  0xb3   :  { %2295 = vmatpush3.bf16.xpose.msra.mxu1 %v3782_v26 }
  0xb4   :  { %2439 = vmatpush3.bf16.xpose.msra.mxu0 %v3783_v37  ;;  %2296 = vmatprep.subr.bf16.mxu1 %v3770_v11 }
  0xb5   :  { %2440 = vmatprep.subr.bf16.mxu0 %v3770_v11 }
  0xbb   :  { %2298 = vmatpush3.bf16.xpose.msra.mxu1 %v3784_v31 }
  0xbc   :  { %2442 = vmatpush3.bf16.xpose.msra.mxu0 %v3785_v56  ;;  %2299 = vmatprep.subr.bf16.mxu1 %v3770_v11  ;;  %v3803_v56 = vand.u32 4294901760, %v2797_v23  ;;  %v3808_v23 = vand.u32 4294901760, %v2888_v45  ;;  %v3814_v45 = vand.u32 4294901760, %v2987_v19  ;;  %v3819_v19 = vand.u32 4294901760, %v3038_v27 }
  0xbd   :  { %2443 = vmatprep.subr.bf16.mxu0 %v3770_v11  ;;  %v3825_v27 = vand.u32 4294901760, %v3063_v34  ;;  %v3831_v34 = vand.u32 4294901760, %v3126_v50  ;;  %v129_v50 = vld [vmem:[#allocation7] sm:$0xff] }
  0xc3   :  { %2301 = vmatpush3.bf16.xpose.msra.mxu1 %v3786_v1  ;;  %v3804_v1 = vand.u32 4294901760, %v2840_v32 }
  0xc4   :  { %2445 = vmatpush3.bf16.xpose.msra.mxu0 %v3787_v7  ;;  %2302 = vmatprep.subr.bf16.mxu1 %v3770_v11 }
  0xc5   :  { %2446 = vmatprep.subr.bf16.mxu0 %v3770_v11  ;;  %v2336_v7 = vpack.c.bf16 %v3804_v1, %v3803_v56  ;;  %v3812_v56 = vand.u32 4294901760, %v2983_v15  ;;  %v3813_v1 = vand.u32 4294901760, %v2985_v16  ;;  %v3817_v15 = vand.u32 4294901760, %v2993_v28 }
  0xc6   :  { %v3818_v16 = vand.u32 4294901760, %v3002_v35  ;;  %v3823_v28 = vand.u32 4294901760, %v3051_v44  ;;  %v3824_v35 = vand.u32 4294901760, %v3061_v41  ;;  %v3828_v44 = vand.u32 4294901760, %v3113_v57 }
  0xc7   :  { %v3830_v41 = vand.u32 4294901760, %v3124_v54 }
  0xcb   :  { %2304 = vmatpush3.bf16.xpose.msra.mxu1 %v3788_v53  ;;  %v3805_v53 = vand.u32 4294901760, %v2828_v30  ;;  %v3809_v30 = vand.u32 4294901760, %v2898_v47  ;;  %v3815_v47 = vand.u32 4294901760, %v2989_v21  ;;  %v3820_v21 = vand.u32 4294901760, %v3045_v61 }
  0xcc   :  { %2448 = vmatpush3.bf16.xpose.msra.mxu0 %v3789_v46  ;;  %2305 = vmatprep.subr.bf16.mxu1 %v3770_v11  ;;  %v3806_v46 = vand.u32 4294901760, %v2842_v33  ;;  %v3810_v33 = vand.u32 4294901760, %v2965_v63  ;;  %v3826_v61 = vand.u32 4294901760, %v3065_v4  ;;  %v3832_v4 = vand.u32 4294901760, %v3134_v2 }
  0xcd   :  { %2449 = vmatprep.subr.bf16.mxu0 %v3770_v11  ;;  %v2339_v32 = vpack.c.bf16 %v3809_v30, %v3808_v23  ;;  %v3821_v23 = vand.u32 4294901760, %v3047_v0  ;;  %v3827_v0 = vand.u32 4294901760, %v3079_v20 }
  0xce   :  { %v2357_v20 = vpack.c.bf16 %v3832_v4, %v322_v6 }
  0xcf   :  { %v2348_v30 = vpack.c.bf16 %v3821_v23, %v3820_v21 }
  0xd3   :  { %2307 = vmatpush3.bf16.xpose.msra.mxu1 %v3790_v3  ;;  %v2480_v3 = vpack.c.bf16 %v3806_v46, %v3805_v53  ;;  %v2486_v53 = vpack.c.bf16 %v3815_v47, %v3814_v45  ;;  %v3816_v46 = vand.u32 4294901760, %v2991_v24  ;;  %v3822_v24 = vand.u32 4294901760, %v3049_v40 }
  0xd4   :  { %2451 = vmatpush3.bf16.xpose.msra.mxu0 %v3791_v58  ;;  %2308 = vmatprep.subr.bf16.mxu1 %v3770_v11  ;;  %v3807_v58 = vld [vmem:[#allocation13_spill] sm:$0xff]  ;;  %v3829_v40 = vand.u32 4294901760, %v3115_v43  ;;  %v2501_v43 = vpack.c.bf16 %v1025_v5, %v1018_v59 }
  0xd5   :  { %2452 = vmatprep.subr.bf16.mxu0 %v3770_v11 }
  0xdb   :  { %2310 = vmatpush3.bf16.xpose.msra.mxu1 %v3792_v52  ;;  %v3811_v52 = vand.u32 4294901760, %v2981_v9 }
  0xdc   :  { %2454 = vmatpush3.bf16.xpose.msra.mxu0 %v3793_v8  ;;  %2311 = vmatprep.subr.bf16.mxu1 %v3770_v11 }
  0xdd   :  { %2455 = vmatprep.subr.bf16.mxu0 %v3770_v11  ;;  %v2483_v8 = vpack.c.bf16 %v3811_v52, %v3810_v33  ;;  %v2351_v33 = vpack.c.bf16 %v3825_v27, %v3824_v35  ;;  %v2495_v52 = vpack.c.bf16 %v3827_v0, %v3826_v61 }
  0xe2   :  { %1922 = vmatmul.mubr.f32.vlgmr.msra.gmra.mrb[4].mxu1 %v3077_v48 }
  0xe3   :  { %2313 = vmatpush3.bf16.xpose.msk.msra.mxu1 %vm2670_vm5, %v3769_v51  ;;  %2132 = vmatmul.mubr.f32.vlgmr.msra.gmra.mrb[0].mxu0 %v3077_v48  ;;  %v3797_v48 = vld [vmem:[#allocation10_spill] sm:$0xff] }
  0xe4   :  { %2457 = vmatpush3.bf16.xpose.msk.msra.mxu0 %vm2682_vm6, %v3769_v51  ;;  %2314 = vmatprep.subr.bf16.mxu1 %v3770_v11 }
  0xe5   :  { %2458 = vmatprep.subr.bf16.mxu0 %v3770_v11  ;;  %1956 = vmatprep.mubr.msk.f32.mxu1 %vm3777_vm14, %v3776_v29 }
  0xe6   :  { %2166 = vmatprep.mubr.msk.f32.mxu0 %vm3777_vm14, %v3776_v29 }
  0xeb   :  { %2316 = vmatpush3.bf16.xpose.msk.msra.mxu1 %vm2705_vm11, %v3769_v51 }
  0xec   :  { %2460 = vmatpush3.bf16.xpose.msk.msra.mxu0 %vm2715_vm12, %v3769_v51  ;;  %2317 = vmatprep.subr.bf16.mxu1 %v3770_v11 }
  0xed   :  { %2461 = vmatprep.subr.bf16.mxu0 %v3770_v11 }
  0xf3   :  { %2319 = vmatpush3.bf16.xpose.msk.msra.mxu1 %vm2747_vm10, %v3769_v51 }
  0xf4   :  { %2463 = vmatpush3.bf16.xpose.msk.msra.mxu0 %vm2757_vm9, %v3769_v51  ;;  %2320 = vmatprep.subr.bf16.mxu1 %v3770_v11 }
  0xf5   :  { %2464 = vmatprep.subr.bf16.mxu0 %v3770_v11 }
  0xfb   :  { %2322 = vmatpush3.bf16.xpose.msk.msra.mxu1 %vm2793_vm8, %v3769_v51 }
  0xfc   :  { %2466 = vmatpush3.bf16.xpose.msk.msra.mxu0 %vm2809_vm1, %v3769_v51  ;;  %2323 = vmatprep.subr.bf16.mxu1 %v3770_v11  ;;  %vm3798_vm1 = vnez %v3797_v48 }
  0xfd   :  { %2467 = vmatprep.subr.bf16.mxu0 %v3770_v11 }
 0x103   :  { %2325 = vmatpush3.bf16.xpose.msk.msra.mxu1 %vm3794_vm7, %v3769_v51 }
 0x104   :  { %2469 = vmatpush3.bf16.xpose.msk.msra.mxu0 %vm3795_vm4, %v3769_v51  ;;  %2326 = vmatprep.subr.bf16.mxu1 %v3770_v11 }
 0x105   :  { %2470 = vmatprep.subr.bf16.mxu0 %v3770_v11 }
 0x10b   :  { %2328 = vmatpush3.bf16.xpose.msk.msra.mxu1 %vm3796_vm3, %v3769_v51 }
 0x10c   :  { %2472 = vmatpush3.bf16.xpose.msk.msra.mxu0 %vm3798_vm1, %v3769_v51  ;;  %2329 = vmatprep.subr.bf16.mxu1 %v3770_v11 }
 0x10d   :  { %2473 = vmatprep.subr.bf16.mxu0 %v3770_v11 }
 0x113   :  { %2331 = vmatpush3.bf16.xpose.msk.msra.mxu1 %vm3057_vm2, %v3769_v51 }
 0x114   :  { %2475 = vmatpush3.bf16.xpose.msk.msra.mxu0 %vm3071_vm13, %v3769_v51  ;;  %2332 = vmatprep.subr.bf16.mxu1 %v3770_v11 }
 0x115   :  { %2476 = vmatprep.subr.bf16.mxu0 %v3770_v11 }
 0x11b   :  { %2334 = vmatpush3.bf16.xpose.msk.msra.mxu1 %vm3144_vm15, %v3769_v51 }
 0x11c   :  { %2478 = vmatpush3.bf16.xpose.msk.msra.mxu0 %vm3160_vm0, %v3769_v51  ;;  %2335 = vmatprep.subr.bf16.mxu1 %v3770_v11 }
 0x11d   :  { %2479 = vmatprep.subr.bf16.mxu0 %v3770_v11 }
 0x122   :  { %1957 = vmatmul.mubr.f32.vlgmr.msra.gmra.mrb[6].mxu1 %v3807_v58 }
 0x123   :  { %2337 = vmatpush3.bf16.xpose.msra.mxu1 %v2336_v7  ;;  %2167 = vmatmul.mubr.f32.vlgmr.msra.gmra.mrb[0].mxu0 %v3807_v58  ;;  %v2342_v7 = vpack.c.bf16 %v3813_v1, %v3812_v56  ;;  %v2489_v58 = vpack.c.bf16 %v3819_v19, %v3818_v16  ;;  %v2498_v56 = vpack.c.bf16 %v3831_v34, %v3830_v41 }
 0x124   :  { %2481 = vmatpush3.bf16.xpose.msra.mxu0 %v2480_v3  ;;  %2338 = vmatprep.subr.bf16.mxu1 %v3770_v11  ;;  %v2345_v3 = vpack.c.bf16 %v3817_v15, %v3816_v46 }
 0x125   :  { %2482 = vmatprep.subr.bf16.mxu0 %v3770_v11  ;;  %1991 = vmatprep.mubr.msk.f32.mxu1 %vm3777_vm14, %v3776_v29 }
 0x126   :  { %2201 = vmatprep.mubr.msk.f32.mxu0 %vm3777_vm14, %v3776_v29 }
 0x12b   :  { %2340 = vmatpush3.bf16.xpose.msra.mxu1 %v2339_v32  ;;  %v2492_v32 = vpack.c.bf16 %v3823_v28, %v3822_v24 }
 0x12c   :  { %2484 = vmatpush3.bf16.xpose.msra.mxu0 %v2483_v8  ;;  %2341 = vmatprep.subr.bf16.mxu1 %v3770_v11  ;;  %v2354_v8 = vpack.c.bf16 %v3829_v40, %v3828_v44 }
 0x12d   :  { %2485 = vmatprep.subr.bf16.mxu0 %v3770_v11 }
 0x133   :  { %2343 = vmatpush3.bf16.xpose.msra.mxu1 %v2342_v7 }
 0x134   :  { %2487 = vmatpush3.bf16.xpose.msra.mxu0 %v2486_v53  ;;  %2344 = vmatprep.subr.bf16.mxu1 %v3770_v11 }
 0x135   :  { %v217_v63 = vpop.f32.mrb[0].mxu1  ;;  %2488 = vmatprep.subr.bf16.mxu0 %v3770_v11 }
 0x136   :  { %v1853_v9 = vpop.f32.mrb[1].mxu1 }
 0x13b   :  { %2346 = vmatpush3.bf16.xpose.msra.mxu1 %v2345_v3 }
 0x13c   :  { %2490 = vmatpush3.bf16.xpose.msra.mxu0 %v2489_v58  ;;  %2347 = vmatprep.subr.bf16.mxu1 %v3770_v11 }
 0x13d   :  { %2491 = vmatprep.subr.bf16.mxu0 %v3770_v11 }
 0x143   :  { %2349 = vmatpush3.bf16.xpose.msra.mxu1 %v2348_v30 }
 0x144   :  { %2493 = vmatpush3.bf16.xpose.msra.mxu0 %v2492_v32  ;;  %2350 = vmatprep.subr.bf16.mxu1 %v3770_v11 }
 0x145   :  { %2494 = vmatprep.subr.bf16.mxu0 %v3770_v11 }
 0x14b   :  { %2352 = vmatpush3.bf16.xpose.msra.mxu1 %v2351_v33 }
 0x14c   :  { %2496 = vmatpush3.bf16.xpose.msra.mxu0 %v2495_v52  ;;  %2353 = vmatprep.subr.bf16.mxu1 %v3770_v11 }
 0x14d   :  { %2497 = vmatprep.subr.bf16.mxu0 %v3770_v11 }
 0x153   :  { %2355 = vmatpush3.bf16.xpose.msra.mxu1 %v2354_v8 }
 0x154   :  { %2499 = vmatpush3.bf16.xpose.msra.mxu0 %v2498_v56  ;;  %2356 = vmatprep.subr.bf16.mxu1 %v3770_v11 }
 0x155   :  { %2500 = vmatprep.subr.bf16.mxu0 %v3770_v11 }
 0x15b   :  { %2358 = vmatpush3.bf16.xpose.msra.mxu1 %v2357_v20 }
 0x15c   :  { %2502 = vmatpush3.bf16.xpose.msra.mxu0 %v2501_v43  ;;  %2359 = vmatprep.subr.bf16.mxu1 %v3770_v11 }
 0x15d   :  { %2503 = vmatprep.subr.bf16.mxu0 %v3770_v11 }
 0x162   :  { %1992 = vmatmul.mubr.f32.vlgmr.msra.gmra.mrb[8].mxu1 %v2909_v49 }
 0x163   :  { %2361 = vmatpush3.bf16.xpose.msk.msra.mxu1 %vm2670_vm5, %v3769_v51  ;;  %2202 = vmatmul.mubr.f32.vlgmr.msra.gmra.mrb[0].mxu0 %v2909_v49  ;;  %vm3833_vm5 = vnez %v3724_v25 }
 0x164   :  { %2505 = vmatpush3.bf16.xpose.msk.msra.mxu0 %vm2682_vm6, %v3769_v51  ;;  %2362 = vmatprep.subr.bf16.mxu1 %v3770_v11 }
 0x165   :  { %2506 = vmatprep.subr.bf16.mxu0 %v3770_v11  ;;  %2026 = vmatprep.mubr.msk.f32.mxu1 %vm3777_vm14, %v3776_v29 }
 0x166   :  { %2236 = vmatprep.mubr.msk.f32.mxu0 %vm3777_vm14, %v3776_v29 }
 0x16b   :  { %2364 = vmatpush3.bf16.xpose.msk.msra.mxu1 %vm2705_vm11, %v3769_v51 }
 0x16c   :  { %2508 = vmatpush3.bf16.xpose.msk.msra.mxu0 %vm2715_vm12, %v3769_v51  ;;  %2365 = vmatprep.subr.bf16.mxu1 %v3770_v11 }
 0x16d   :  { %2509 = vmatprep.subr.bf16.mxu0 %v3770_v11 }
 0x173   :  { %2367 = vmatpush3.bf16.xpose.msk.msra.mxu1 %vm2747_vm10, %v3769_v51 }
 0x174   :  { %2511 = vmatpush3.bf16.xpose.msk.msra.mxu0 %vm2757_vm9, %v3769_v51  ;;  %2368 = vmatprep.subr.bf16.mxu1 %v3770_v11 }
 0x175   :  { %v368_v2 = vpop.f32.mrb[2].mxu1  ;;  %2512 = vmatprep.subr.bf16.mxu0 %v3770_v11 }
 0x176   :  { %v369_v10 = vadd.f32 %v368_v2, %v217_v63  ;;  %v1888_v12 = vpop.f32.mrb[3].mxu1 }
 0x17b   :  { %2370 = vmatpush3.bf16.xpose.msk.msra.mxu1 %vm2793_vm8, %v3769_v51 }
 0x17c   :  { %2514 = vmatpush3.bf16.xpose.msk.msra.mxu0 %vm3833_vm5, %v3769_v51  ;;  %2371 = vmatprep.subr.bf16.mxu1 %v3770_v11 }
 0x17d   :  { %2515 = vmatprep.subr.bf16.mxu0 %v3770_v11 }
 0x183   :  { %2373 = vmatpush3.bf16.xpose.msk.msra.mxu1 %vm3794_vm7, %v3769_v51 }
 0x184   :  { %2517 = vmatpush3.bf16.xpose.msk.msra.mxu0 %vm3795_vm4, %v3769_v51  ;;  %2374 = vmatprep.subr.bf16.mxu1 %v3770_v11 }
 0x185   :  { %2518 = vmatprep.subr.bf16.mxu0 %v3770_v11 }
 0x18b   :  { %2376 = vmatpush3.bf16.xpose.msk.msra.mxu1 %vm3796_vm3, %v3769_v51 }
 0x18c   :  { %2520 = vmatpush3.bf16.xpose.msk.msra.mxu0 %vm3798_vm1, %v3769_v51  ;;  %2377 = vmatprep.subr.bf16.mxu1 %v3770_v11 }
 0x18d   :  { %2521 = vmatprep.subr.bf16.mxu0 %v3770_v11 }
 0x193   :  { %2379 = vmatpush3.bf16.xpose.msk.msra.mxu1 %vm3057_vm2, %v3769_v51 }
 0x194   :  { %2523 = vmatpush3.bf16.xpose.msk.msra.mxu0 %vm3071_vm13, %v3769_v51  ;;  %2380 = vmatprep.subr.bf16.mxu1 %v3770_v11 }
 0x195   :  { %2524 = vmatprep.subr.bf16.mxu0 %v3770_v11 }
 0x19b   :  { %2382 = vmatpush3.bf16.xpose.msk.msra.mxu1 %vm3144_vm15, %v3769_v51 }
 0x19c   :  { %2526 = vmatpush3.bf16.xpose.msk.msra.mxu0 %vm3160_vm0, %v3769_v51 }
 0x1a2   :  { %2027 = vmatmul.mubr.f32.vlgmr.msra.gmra.mrb[10].mxu1 %v2909_v49 }
 0x1a3   :  { %2237 = vmatmul.mubr.f32.vlgmr.msra.gmra.mrb[0].mxu0 %v2909_v49 }
 0x1b5   :  { %v472_v13 = vpop.f32.mrb[4].mxu1 }
 0x1b6   :  { %v473_v14 = vadd.f32 %v472_v13, %v369_v10  ;;  %v1923_v17 = vpop.f32.mrb[5].mxu1 }
 0x1f5   :  { %v561_v18 = vpop.f32.mrb[6].mxu1 }
 0x1f6   :  { %v562_v22 = vadd.f32 %v561_v18, %v473_v14  ;;  %v1958_v25 = vpop.f32.mrb[7].mxu1 }
 0x235   :  { %v680_v36 = vpop.f32.mrb[8].mxu1 }
 0x236   :  { %v681_v11 = vadd.f32 %v680_v36, %v562_v22  ;;  %v1993_v39 = vpop.f32.mrb[9].mxu1 }
 0x275   :  { %v767_v54 = vpop.f32.mrb[10].mxu1 }
 0x276   :  { %v768_v62 = vadd.f32 %v767_v54, %v681_v11  ;;  %v1463_v38 = vpop.f32.mrb[0].mxu0  ;;  %v2028_v57 = vpop.f32.mrb[11].mxu1 }
 0x277   :  { %v2238_v55 = vpop.f32.mrb[1].mxu0 }
 0x278   :  { %v771_v51 = vadd.f32 %v768_v62, %v129_v50 }
 0x27a   :  { %v1467_v42 = vsub.f32 %v771_v51, %v1463_v38 }
 0x27c   :  { %1468 = vst [vmem:[#allocation7] sm:$0xff] %v1467_v42 }
 0x27d PF:  { %s2598_s0 = smov [#allocation7]  }
 0x27e   :  { %s1475_s1 = sshll.u32 %s2598_s0, 4  ;;  %s1476_s1 = int_to_ptr.vmem [resolvable:$true] %s1475_s1 }
 0x27f   :  { %s2566_s29 = scalar_lea.vmem %s1476_s1, 128  ;;  %p2571_p10 = scmp.lt.s32.totalorder %s1476_s1, %s1476_s1 }
 0x280   :  { %p2567_p9 = scmp.ne.s32.totalorder %s1476_s1, %s2566_s29  ;;  %p2572_p11 = scmp.lt.s32.totalorder %s2566_s29, %s2566_s29 }
 0x282   :  { %p2573_p12 = por %p2572_p11, %p2571_p10 }
 0x284   :  { %p2574_p13 = pnand %p2573_p12, %p2567_p9 }
 0x286   :  { %2577 = shalt.err (!%p2574_p13)
}
 0x287   :  { %s2578_s5 = scalar_lea.hbm %s3640_s3, 128 }
 0x288   :  { %p2579_p0 = scmp.ne.s32.totalorder %s3640_s3, %s2578_s5  ;;  %p2582_p1 = scmp.lt.u32.totalorder %s2578_s5, %s3640_s3 }
 0x28a   :  { %p2584_p2 = pnand %p2582_p1, %p2579_p0 }
 0x28c   :  { %2587 = shalt.err (!%p2584_p2)
}
 0x28d   :  { %1478 = dma.vmem_to_hbm [thread:$0]  %s1476_s1, 128, %s3640_s3, [#allocation6]  }
 0x28e   :  { %2590 = dma.done.wait [#allocation6], 128  }
 0x28f   :  { %2591 = vsyncadd [#allocation6], 4294967168 }
 0x290   :  { %1482 = vsyncpa [#allocation5], 1 }
 0x291   :  { %1483 = vsyncpa [#allocation6], 1 }

</bundles_post_ra>
